<compile_context>
chip_gen: v7x
topology: tpu7x:2x2x1
jax: 0.10.0
libtpu: 0.0.40
codegen_flags: <defaults>
</compile_context>

<pallas_src>
import math

import jax
import jax.numpy as jnp
from jax.experimental import pallas as pl
from jax.experimental.pallas import tpu as pltpu

_NEG_LARGE = -1e30  # "minus infinity" used for masking / padding (never the sole exp arg)


def _gp_ce_kernel(pred_ref, true_ref, loss_ref, m_neg, s_neg, m_pos, s_pos):
    k = pl.program_id(1)

    @pl.when(k == 0)
    def _():
        # logsumexp([x..., 0]): the implicit 0 logit is folded into the init
        # of the online reduction: running max m = 0, running sum s = 1.
        m_neg[...] = jnp.zeros_like(m_neg)
        s_neg[...] = jnp.ones_like(s_neg)
        m_pos[...] = jnp.zeros_like(m_pos)
        s_pos[...] = jnp.ones_like(s_pos)

    y_pred = pred_ref[...].astype(jnp.float32)          # (tile_rows, tile_n)
    is_pos = true_ref[...].astype(jnp.float32) > 0.5    # (tile_rows, tile_n) bool

    # Select-based masking (replaces the +/-1e12 subtractions):
    #   neg branch keeps  y_pred  where label == 0
    #   pos branch keeps -y_pred  where label == 1
    neg_vals = jnp.where(is_pos, _NEG_LARGE, y_pred)
    pos_vals = jnp.where(is_pos, -y_pred, _NEG_LARGE)

    m_neg_new = jnp.maximum(m_neg[...], jnp.max(neg_vals, axis=-1, keepdims=True))
    m_pos_new = jnp.maximum(m_pos[...], jnp.max(pos_vals, axis=-1, keepdims=True))

    # One exp per element; route the result into the pos/neg running sums.
    x = jnp.where(is_pos, -y_pred, y_pred)
    m_sel = jnp.where(is_pos, m_pos_new, m_neg_new)
    e = jnp.exp(x - m_sel)                               # always <= 1, no overflow
    e_neg = jnp.where(is_pos, 0.0, e)
    e_pos = jnp.where(is_pos, e, 0.0)

    s_neg[...] = s_neg[...] * jnp.exp(m_neg[...] - m_neg_new) + jnp.sum(
        e_neg, axis=-1, keepdims=True)
    s_pos[...] = s_pos[...] * jnp.exp(m_pos[...] - m_pos_new) + jnp.sum(
        e_pos, axis=-1, keepdims=True)
    m_neg[...] = m_neg_new
    m_pos[...] = m_pos_new

    @pl.when(k == pl.num_programs(1) - 1)
    def _():
        loss_ref[...] = (m_neg[...] + jnp.log(s_neg[...])
                         + m_pos[...] + jnp.log(s_pos[...]))


def _round_up(x, m):
    return ((x + m - 1) // m) * m


def global_pointer_crossentropy(logits, targets, reduction="mean"):
    assert reduction in ("none", "mean", "sum")
    assert logits.shape == targets.shape
    assert logits.ndim >= 2
    b, h = logits.shape[0], logits.shape[1]
    bh = b * h
    n = math.prod(logits.shape[2:]) if logits.ndim > 2 else 1

    y_pred = jnp.reshape(logits, (bh, n))
    y_true = jnp.reshape(targets, (bh, n))

    pred_isz = jnp.dtype(y_pred.dtype).itemsize
    true_isz = jnp.dtype(y_true.dtype).itemsize

    # ---- Lane (N) tile: stream the row reduction in chunks of <= 2048 lanes,
    # so VMEM is decoupled from L^2 (L=512 -> N=262144 would not fit otherwise).
    tile_n = min(_round_up(n, 128), 2048)
    n_pad = _round_up(n, tile_n)

    # ---- Row tile: largest multiple of the minimum sublane tile that keeps
    # the double-buffered input blocks inside a per-generation VMEM budget.
    min_rows = max(8, 32 // max(1, min(pred_isz, true_isz, 4)))  # 8/16/32 for f32/bf16/i8
    vmem_budget = 16 * 1024 * 1024
    try:
        phys = pltpu.get_tpu_info().vmem_capacity_bytes
        vmem_budget = max(12 * 1024 * 1024, min(phys // 4, 24 * 1024 * 1024))
    except Exception:
        pass
    per_row = 2 * tile_n * (pred_isz + true_isz)   # 2-deep pipeline, both inputs
    tile_rows = (vmem_budget // per_row) // min_rows * min_rows
    tile_rows = int(max(min_rows, min(tile_rows, 512, _round_up(bh, min_rows))))
    bh_pad = _round_up(bh, tile_rows)

    pad_r, pad_c = bh_pad - bh, n_pad - n
    if pad_r or pad_c:
        # Padded logits = -1e30 (contribute exp(-1e30 - m) == 0), labels = 0.
        y_pred = jnp.pad(y_pred, ((0, pad_r), (0, pad_c)),
                         constant_values=_NEG_LARGE)
        y_true = jnp.pad(y_true, ((0, pad_r), (0, pad_c)))

    grid = (bh_pad // tile_rows, n_pad // tile_n)

    losses = pl.pallas_call(
        _gp_ce_kernel,
        out_shape=jax.ShapeDtypeStruct((bh_pad, 1), jnp.float32),
        grid_spec=pltpu.PrefetchScalarGridSpec(
            num_scalar_prefetch=0,
            grid=grid,
            in_specs=[
                pl.BlockSpec((tile_rows, tile_n), lambda i, k: (i, k)),
                pl.BlockSpec((tile_rows, tile_n), lambda i, k: (i, k)),
            ],
            # Output block revisited across k: resident in VMEM, written once
            # at the last lane-tile.  Output traffic is negligible (bh floats).
            out_specs=pl.BlockSpec((tile_rows, 1), lambda i, k: (i, 0)),
            scratch_shapes=[pltpu.VMEM((tile_rows, 1), jnp.float32)] * 4,
        ),
        compiler_params=pltpu.CompilerParams(
            # Row axis is safe to shard across TensorCores (v7x megacore);
            # the streaming-reduction axis stays sequential.
            dimension_semantics=("parallel", "arbitrary"),
            # <= 64 MiB physical on v7x; actual use is bounded by vmem_budget.
            vmem_limit_bytes=48 * 1024 * 1024,
        ),
    )(y_pred, y_true)

    per_row_loss = losses[:bh, 0]
    if reduction == "none":
        return per_row_loss
    if reduction == "sum":
        return jnp.sum(per_row_loss)
    return jnp.mean(per_row_loss)


def _reference(logits, targets, reduction="mean"):
    bh = logits.shape[0] * logits.shape[1]
    y_pred = jnp.reshape(logits, (bh, -1)).astype(jnp.float32)
    y_true = jnp.reshape(targets, (bh, -1)).astype(jnp.float32)
    y_pred = (1.0 - 2.0 * y_true) * y_pred
    y_neg = y_pred - y_true * 1e12
    y_pos = y_pred - (1.0 - y_true) * 1e12
    zeros = jnp.zeros_like(y_pred[..., :1])
    neg = jax.scipy.special.logsumexp(jnp.concatenate([y_neg, zeros], -1), axis=-1)
    pos = jax.scipy.special.logsumexp(jnp.concatenate([y_pos, zeros], -1), axis=-1)
    loss = neg + pos
    if reduction == "mean":
        return jnp.mean(loss)
    if reduction == "sum":
        return jnp.sum(loss)
    return loss


if __name__ == "__main__":
    key = jax.random.PRNGKey(0)
    k1, k2 = jax.random.split(key)
    B, H, L = 2, 4, 8
    logits = jax.random.normal(k1, (B, H, L, L), dtype=jnp.float32) * 2.0
    targets = (jax.random.uniform(k2, (B, H, L, L)) < 0.1).astype(jnp.float32)

    ok = True
    for red in ("mean", "sum", "none"):
        out = jax.block_until_ready(
            global_pointer_crossentropy(logits, targets, reduction=red))
        ref = jax.block_until_ready(_reference(logits, targets, reduction=red))
        ok = ok and bool(jnp.allclose(out, ref, rtol=1e-5, atol=1e-5))
    assert ok, "Pallas kernel does not match reference"
    print("KERNEL_OK")
</pallas_src>

<mosaic_0001>
module attributes {stable_mosaic.version = 11 : i64} {
  func.func @_gp_ce_kernel(%arg0: i32, %arg1: i32, %arg2: memref<8x128xf32, #tpu.memory_space<vmem>>, %arg3: memref<8x128xf32, #tpu.memory_space<vmem>>, %arg4: memref<8x1xf32, #tpu.memory_space<vmem>>, %arg5: memref<8x1xf32, #tpu.memory_space<vmem>>, %arg6: memref<8x1xf32, #tpu.memory_space<vmem>>, %arg7: memref<8x1xf32, #tpu.memory_space<vmem>>, %arg8: memref<8x1xf32, #tpu.memory_space<vmem>>) attributes {dimension_semantics = [#tpu.dimension_semantics<parallel>, #tpu.dimension_semantics<arbitrary>], iteration_bounds = array<i64: 1, 1>, scalar_prefetch = 0 : i64, scratch_operands = 4 : i64, tpu.core_type = #tpu.core_type<tc>, window_params = [{transform_indices = @transform_0, window_bounds = array<i64: 8, 128>}, {transform_indices = @transform_1, window_bounds = array<i64: 8, 128>}, {transform_indices = @transform_2, window_bounds = array<i64: 8, 1>}]} {
    %c0_i32 = arith.constant 0 : i32
    %0 = arith.cmpi eq, %arg1, %c0_i32 : i32
    %1 = arith.extui %0 : i1 to i32
    %c0_i32_0 = arith.constant 0 : i32
    %2 = arith.cmpi ne, %1, %c0_i32_0 : i32
    scf.if %2 {
      %cst_36 = arith.constant 0.000000e+00 : f32
      %58 = vector.broadcast %cst_36 : f32 to vector<8x1xf32>
      %c0_37 = arith.constant 0 : index
      %c0_38 = arith.constant 0 : index
      %59 = vector.load %arg5[%c0_37, %c0_38] : memref<8x1xf32, #tpu.memory_space<vmem>>, vector<8x1xf32>
      tpu.vector_store %arg5[%c0_37, %c0_38], %58 {strides = array<i32>} : memref<8x1xf32, #tpu.memory_space<vmem>>, vector<8x1xf32>,
      %cst_39 = arith.constant 1.000000e+00 : f32
      %60 = vector.broadcast %cst_39 : f32 to vector<8x1xf32>
      %c0_40 = arith.constant 0 : index
      %c0_41 = arith.constant 0 : index
      %61 = vector.load %arg6[%c0_40, %c0_41] : memref<8x1xf32, #tpu.memory_space<vmem>>, vector<8x1xf32>
      tpu.vector_store %arg6[%c0_40, %c0_41], %60 {strides = array<i32>} : memref<8x1xf32, #tpu.memory_space<vmem>>, vector<8x1xf32>,
      %cst_42 = arith.constant 0.000000e+00 : f32
      %62 = vector.broadcast %cst_42 : f32 to vector<8x1xf32>
      %c0_43 = arith.constant 0 : index
      %c0_44 = arith.constant 0 : index
      %63 = vector.load %arg7[%c0_43, %c0_44] : memref<8x1xf32, #tpu.memory_space<vmem>>, vector<8x1xf32>
      tpu.vector_store %arg7[%c0_43, %c0_44], %62 {strides = array<i32>} : memref<8x1xf32, #tpu.memory_space<vmem>>, vector<8x1xf32>,
      %cst_45 = arith.constant 1.000000e+00 : f32
      %64 = vector.broadcast %cst_45 : f32 to vector<8x1xf32>
      %c0_46 = arith.constant 0 : index
      %c0_47 = arith.constant 0 : index
      %65 = vector.load %arg8[%c0_46, %c0_47] : memref<8x1xf32, #tpu.memory_space<vmem>>, vector<8x1xf32>
      tpu.vector_store %arg8[%c0_46, %c0_47], %64 {strides = array<i32>} : memref<8x1xf32, #tpu.memory_space<vmem>>, vector<8x1xf32>,
    } else {
    }
    %c0 = arith.constant 0 : index
    %c0_1 = arith.constant 0 : index
    %3 = vector.load %arg2[%c0, %c0_1] : memref<8x128xf32, #tpu.memory_space<vmem>>, vector<8x128xf32>
    %c0_2 = arith.constant 0 : index
    %c0_3 = arith.constant 0 : index
    %4 = vector.load %arg3[%c0_2, %c0_3] : memref<8x128xf32, #tpu.memory_space<vmem>>, vector<8x128xf32>
    %cst = arith.constant 5.000000e-01 : f32
    %5 = vector.broadcast %cst : f32 to vector<8x128xf32>
    %6 = arith.cmpf ogt, %4, %5 : vector<8x128xf32>
    %cst_4 = arith.constant -1.000000e+30 : f32
    %7 = vector.broadcast %cst_4 : f32 to vector<8x128xf32>
    %8 = arith.select %6, %7, %3 : vector<8x128xi1>, vector<8x128xf32>
    %cst_5 = arith.constant 0.000000e+00 : f32
    %9 = vector.broadcast %cst_5 : f32 to vector<8x128xf32>
    %10 = arith.subf %9, %3 : vector<8x128xf32>
    %cst_6 = arith.constant -1.000000e+30 : f32
    %11 = vector.broadcast %cst_6 : f32 to vector<8x128xf32>
    %12 = arith.select %6, %10, %11 : vector<8x128xi1>, vector<8x128xf32>
    %c0_7 = arith.constant 0 : index
    %c0_8 = arith.constant 0 : index
    %13 = vector.load %arg5[%c0_7, %c0_8] : memref<8x1xf32, #tpu.memory_space<vmem>>, vector<8x1xf32>
    %cst_9 = arith.constant dense<0xFF800000> : vector<8xf32>
    %14 = vector.multi_reduction <maximumf>, %8, %cst_9 [1] : vector<8x128xf32> to vector<8xf32>
    %15 = vector.shape_cast %14 : vector<8xf32> to vector<8x1xf32>
    %16 = arith.maximumf %13, %15 : vector<8x1xf32>
    %c0_10 = arith.constant 0 : index
    %c0_11 = arith.constant 0 : index
    %17 = vector.load %arg7[%c0_10, %c0_11] : memref<8x1xf32, #tpu.memory_space<vmem>>, vector<8x1xf32>
    %cst_12 = arith.constant dense<0xFF800000> : vector<8xf32>
    %18 = vector.multi_reduction <maximumf>, %12, %cst_12 [1] : vector<8x128xf32> to vector<8xf32>
    %19 = vector.shape_cast %18 : vector<8xf32> to vector<8x1xf32>
    %20 = arith.maximumf %17, %19 : vector<8x1xf32>
    %cst_13 = arith.constant 0.000000e+00 : f32
    %21 = vector.broadcast %cst_13 : f32 to vector<8x128xf32>
    %22 = arith.subf %21, %3 : vector<8x128xf32>
    %23 = arith.select %6, %22, %3 : vector<8x128xi1>, vector<8x128xf32>
    %24 = vector.shape_cast %20 : vector<8x1xf32> to vector<8x1xf32>
    %25 = vector.broadcast %24 : vector<8x1xf32> to vector<8x128xf32>
    %26 = vector.shape_cast %16 : vector<8x1xf32> to vector<8x1xf32>
    %27 = vector.broadcast %26 : vector<8x1xf32> to vector<8x128xf32>
    %28 = arith.select %6, %25, %27 : vector<8x128xi1>, vector<8x128xf32>
    %29 = arith.subf %23, %28 : vector<8x128xf32>
    %30 = math.exp %29 : vector<8x128xf32>
    %cst_14 = arith.constant 0.000000e+00 : f32
    %31 = vector.broadcast %cst_14 : f32 to vector<8x128xf32>
    %32 = arith.select %6, %31, %30 : vector<8x128xi1>, vector<8x128xf32>
    %cst_15 = arith.constant 0.000000e+00 : f32
    %33 = vector.broadcast %cst_15 : f32 to vector<8x128xf32>
    %34 = arith.select %6, %30, %33 : vector<8x128xi1>, vector<8x128xf32>
    %c0_16 = arith.constant 0 : index
    %c0_17 = arith.constant 0 : index
    %35 = vector.load %arg6[%c0_16, %c0_17] : memref<8x1xf32, #tpu.memory_space<vmem>>, vector<8x1xf32>
    %c0_18 = arith.constant 0 : index
    %c0_19 = arith.constant 0 : index
    %36 = vector.load %arg5[%c0_18, %c0_19] : memref<8x1xf32, #tpu.memory_space<vmem>>, vector<8x1xf32>
    %37 = arith.subf %36, %16 : vector<8x1xf32>
    %38 = math.exp %37 : vector<8x1xf32>
    %39 = arith.mulf %35, %38 : vector<8x1xf32>
    %cst_20 = arith.constant dense<0.000000e+00> : vector<8xf32>
    %40 = vector.multi_reduction <add>, %32, %cst_20 [1] : vector<8x128xf32> to vector<8xf32>
    %41 = vector.shape_cast %40 : vector<8xf32> to vector<8x1xf32>
    %42 = arith.addf %39, %41 : vector<8x1xf32>
    %c0_21 = arith.constant 0 : index
    %c0_22 = arith.constant 0 : index
    %43 = vector.load %arg6[%c0_21, %c0_22] : memref<8x1xf32, #tpu.memory_space<vmem>>, vector<8x1xf32>
    tpu.vector_store %arg6[%c0_21, %c0_22], %42 {strides = array<i32>} : memref<8x1xf32, #tpu.memory_space<vmem>>, vector<8x1xf32>,
    %c0_23 = arith.constant 0 : index
    %c0_24 = arith.constant 0 : index
    %44 = vector.load %arg8[%c0_23, %c0_24] : memref<8x1xf32, #tpu.memory_space<vmem>>, vector<8x1xf32>
    %c0_25 = arith.constant 0 : index
    %c0_26 = arith.constant 0 : index
    %45 = vector.load %arg7[%c0_25, %c0_26] : memref<8x1xf32, #tpu.memory_space<vmem>>, vector<8x1xf32>
    %46 = arith.subf %45, %20 : vector<8x1xf32>
    %47 = math.exp %46 : vector<8x1xf32>
    %48 = arith.mulf %44, %47 : vector<8x1xf32>
    %cst_27 = arith.constant dense<0.000000e+00> : vector<8xf32>
    %49 = vector.multi_reduction <add>, %34, %cst_27 [1] : vector<8x128xf32> to vector<8xf32>
    %50 = vector.shape_cast %49 : vector<8xf32> to vector<8x1xf32>
    %51 = arith.addf %48, %50 : vector<8x1xf32>
    %c0_28 = arith.constant 0 : index
    %c0_29 = arith.constant 0 : index
    %52 = vector.load %arg8[%c0_28, %c0_29] : memref<8x1xf32, #tpu.memory_space<vmem>>, vector<8x1xf32>
    tpu.vector_store %arg8[%c0_28, %c0_29], %51 {strides = array<i32>} : memref<8x1xf32, #tpu.memory_space<vmem>>, vector<8x1xf32>,
    %c0_30 = arith.constant 0 : index
    %c0_31 = arith.constant 0 : index
    %53 = vector.load %arg5[%c0_30, %c0_31] : memref<8x1xf32, #tpu.memory_space<vmem>>, vector<8x1xf32>
    tpu.vector_store %arg5[%c0_30, %c0_31], %16 {strides = array<i32>} : memref<8x1xf32, #tpu.memory_space<vmem>>, vector<8x1xf32>,
    %c0_32 = arith.constant 0 : index
    %c0_33 = arith.constant 0 : index
    %54 = vector.load %arg7[%c0_32, %c0_33] : memref<8x1xf32, #tpu.memory_space<vmem>>, vector<8x1xf32>
    tpu.vector_store %arg7[%c0_32, %c0_33], %20 {strides = array<i32>} : memref<8x1xf32, #tpu.memory_space<vmem>>, vector<8x1xf32>,
    %c0_i32_34 = arith.constant 0 : i32
    %55 = arith.cmpi eq, %arg1, %c0_i32_34 : i32
    %56 = arith.extui %55 : i1 to i32
    %c0_i32_35 = arith.constant 0 : i32
    %57 = arith.cmpi ne, %56, %c0_i32_35 : i32
    scf.if %57 {
      %c0_36 = arith.constant 0 : index
      %c0_37 = arith.constant 0 : index
      %58 = vector.load %arg5[%c0_36, %c0_37] : memref<8x1xf32, #tpu.memory_space<vmem>>, vector<8x1xf32>
      %c0_38 = arith.constant 0 : index
      %c0_39 = arith.constant 0 : index
      %59 = vector.load %arg6[%c0_38, %c0_39] : memref<8x1xf32, #tpu.memory_space<vmem>>, vector<8x1xf32>
      %60 = math.log %59 : vector<8x1xf32>
      %61 = arith.addf %58, %60 : vector<8x1xf32>
      %c0_40 = arith.constant 0 : index
      %c0_41 = arith.constant 0 : index
      %62 = vector.load %arg7[%c0_40, %c0_41] : memref<8x1xf32, #tpu.memory_space<vmem>>, vector<8x1xf32>
      %63 = arith.addf %61, %62 : vector<8x1xf32>
      %c0_42 = arith.constant 0 : index
      %c0_43 = arith.constant 0 : index
      %64 = vector.load %arg8[%c0_42, %c0_43] : memref<8x1xf32, #tpu.memory_space<vmem>>, vector<8x1xf32>
      %65 = math.log %64 : vector<8x1xf32>
      %66 = arith.addf %63, %65 : vector<8x1xf32>
      %c0_44 = arith.constant 0 : index
      %c0_45 = arith.constant 0 : index
      %67 = vector.load %arg4[%c0_44, %c0_45] : memref<8x1xf32, #tpu.memory_space<vmem>>, vector<8x1xf32>
      tpu.vector_store %arg4[%c0_44, %c0_45], %66 {strides = array<i32>} : memref<8x1xf32, #tpu.memory_space<vmem>>, vector<8x1xf32>,
    } else {
    }
    return
  }
  func.func @transform_0(%arg0: i32, %arg1: i32) -> (i32, i32) {
    %c0_i32 = arith.constant 0 : i32
    return %arg0, %arg1 : i32, i32
  }
  func.func @transform_1(%arg0: i32, %arg1: i32) -> (i32, i32) {
    %c0_i32 = arith.constant 0 : i32
    return %arg0, %arg1 : i32, i32
  }
  func.func @transform_2(%arg0: i32, %arg1: i32) -> (i32, i32) {
    %c0_i32 = arith.constant 0 : i32
    %c0_i32_0 = arith.constant 0 : i32
    return %arg0, %c0_i32 : i32, i32
  }
}

</mosaic_0001>

<bundles_post_ra>
// kernel: tpu_custom_call.1
= control target key start
LH: loop header
LB: loop body
LE: loop exit
PB: predicated region body
PF: predicated region fallthrough
CT: control target
= control target key end

     0   :  { %7 = vsyncpa [#allocation7], 0  ;;  %s245_s0 = inlined_call_operand.hbm [shape: f32[8,128], index: 0, kind: input, shape index: {}]   ;;  %s246_s1 = inlined_call_operand.hbm [shape: f32[8,128], index: 1, kind: input, shape index: {}]   ;;  %s247_s2 = inlined_call_operand.vmem [shape: f32[8,1], index: 2, kind: output, shape index: {}]  }
   0x1   :  { %8 = vsyncpa [#allocation9], 0  ;;  %s183_s9 = smov [#allocation6]   ;;  %s184_s11 = smov [#allocation8]  }
   0x2   :  { %s15_s10 = sshll.u32 %s183_s9, 4  ;;  %s25_s12 = sshll.u32 %s184_s11, 4  ;;  %s16_s10 = int_to_ptr.vmem [resolvable:$true] %s15_s10  ;;  %s26_s12 = int_to_ptr.vmem [resolvable:$true] %s25_s12 }
   0x3   :  { %s135_s15 = scalar_lea.hbm %s245_s0, 128 }
   0x4   :  { %p136_p0 = scmp.ne.s32.totalorder %s245_s0, %s135_s15  ;;  %p139_p1 = scmp.lt.u32.totalorder %s135_s15, %s245_s0 }
   0x6   :  { %p141_p2 = pnand %p139_p1, %p136_p0 }
   0x8   :  { %144 = shalt.err (!%p141_p2)
}
   0x9   :  { %s145_s20 = scalar_lea.vmem %s16_s10, 128  ;;  %p150_p4 = scmp.lt.s32.totalorder %s16_s10, %s16_s10 }
   0xa   :  { %p146_p3 = scmp.ne.s32.totalorder %s16_s10, %s145_s20  ;;  %p151_p5 = scmp.lt.s32.totalorder %s145_s20, %s145_s20 }
   0xc   :  { %p152_p6 = por %p151_p5, %p150_p4 }
   0xe   :  { %p153_p7 = pnand %p152_p6, %p146_p3 }
  0x10   :  { %156 = shalt.err (!%p153_p7)
}
  0x11   :  { %18 = dma.hbm_to_vmem [thread:$0]  %s245_s0, 128, %s16_s10, [#allocation7]  }
  0x12   :  { %s157_s25 = scalar_lea.hbm %s246_s1, 128 }
  0x13   :  { %p158_p8 = scmp.ne.s32.totalorder %s246_s1, %s157_s25  ;;  %p161_p9 = scmp.lt.u32.totalorder %s157_s25, %s246_s1 }
  0x15   :  { %p163_p10 = pnand %p161_p9, %p158_p8 }
  0x17   :  { %166 = shalt.err (!%p163_p10)
}
  0x18   :  { %s167_s30 = scalar_lea.vmem %s26_s12, 128  ;;  %p172_p12 = scmp.lt.s32.totalorder %s26_s12, %s26_s12 }
  0x19   :  { %p168_p11 = scmp.ne.s32.totalorder %s26_s12, %s167_s30  ;;  %p173_p13 = scmp.lt.s32.totalorder %s167_s30, %s167_s30 }
  0x1b   :  { %p174_p0 = por %p173_p13, %p172_p12 }
  0x1d   :  { %p175_p1 = pnand %p174_p0, %p168_p11 }
  0x1f   :  { %178 = shalt.err (!%p175_p1)
}
  0x20   :  { %28 = dma.hbm_to_vmem [thread:$0]  %s246_s1, 128, %s26_s12, [#allocation9]  }
  0x21   :  { %179 = dma.done.wait [#allocation7], 128  }
  0x22   :  { %180 = vsyncadd [#allocation7], 4294967168 }
  0x23   :  { %181 = dma.done.wait [#allocation9], 128  }
  0x24   :  { %182 = vsyncadd [#allocation9], 4294967168  ;;  %vm39_vm0 = vcmask 7168   ;;  %v185_v0 = vmov 0.0   ;;  %v44_v1 = vld [vmem:[#allocation6] sm:$0xff]  ;;  %v45_v2 = vld [vmem:[#allocation8] sm:$0xff] }
  0x25   :  { %40 = vst.msk [vmem:[#allocation2] sm:$0xff] %vm39_vm0, %v185_v0  ;;  %42 = vst.msk [vmem:[#allocation4] sm:$0xff] %vm39_vm0, %v185_v0  ;;  %vm46_vm1 = vcmp.gt.f32.partialorder %v45_v2, 0.5  ;;  %v48_v3 = vsub.f32 0.0, %v44_v1  ;;  %v186_v6 = vmov 0   ;;  %v187_v7 = vmov 1.0  }
  0x26   :  { %v47_v4 = vsel %vm46_vm1, -1e+30, %v44_v1  ;;  %123 = vset.pattern.permute.xlu1 %v186_v6  ;;  %124 = vset.pattern.permute.xlu0 %v186_v6  ;;  %43 = vst.msk [vmem:[#allocation5] sm:$0xff] %vm39_vm0, %v187_v7  ;;  %41 = vst.msk [vmem:[#allocation3] sm:$0xff] %vm39_vm0, %v187_v7 }
  0x27   :  { %51 = vmax.xlane.f32.xlu0 %v47_v4  ;;  %v49_v5 = vsel %vm46_vm1, %v48_v3, -1e+30  ;;  %v58_v17 = vsel %vm46_vm1, %v48_v3, %v44_v1 }
  0x2b   :  { %55 = vmax.xlane.f32.xlu0 %v49_v5 }
  0x2c   :  { %v50_v8 = vld [vmem:[#allocation2] sm:$0xff]  ;;  %v54_v11 = vld [vmem:[#allocation4] sm:$0xff] }
  0x2d   :  { %v85_v29 = vld [vmem:[#allocation5] sm:$0xff]  ;;  %v75_v30 = vld [vmem:[#allocation3] sm:$0xff] }
  0xb4   :  { %v52_v9 = vpop.xlane.xlu0 %51 }
  0xb5   :  { %v53_v10 = vmax.f32 %v50_v8, %v52_v9 }
  0xb7   :  { %v76_v12 = vsub.f32 %v50_v8, %v53_v10  ;;  %95 = vst.msk [vmem:[#allocation2] sm:$0xff] %vm39_vm0, %v53_v10 }
  0xb8   :  { %v56_v13 = vpop.xlane.xlu0 %55 }
  0xb9   :  { %v57_v14 = vmax.f32 %v54_v11, %v56_v13  ;;  %v77_v25 = vmul.f32 1.442695, %v76_v12 }
  0xbb   :  { %v87_v15 = vsub.f32 %v54_v11, %v57_v14  ;;  %96 = vst.msk [vmem:[#allocation4] sm:$0xff] %vm39_vm0, %v57_v14  ;;  %61 = vperm.xlu1 %123, %v57_v14  }
  0xbd   :  { %v88_v26 = vmul.f32 1.442695, %v87_v15 }
  0xbe   :  { %v100_v42 = vld [vmem:[#allocation2] sm:$0xff] }
  0xbf   :  { %66 = vperm.xlu1 %123, %v53_v10  }
  0xc2   :  { %v105_v44 = vld [vmem:[#allocation4] sm:$0xff] }
 0x13a   :  { %v62_v16 = vpop.permute.xlu1 %61 }
 0x13e   :  { %v67_v18 = vpop.permute.xlu1 %66 }
 0x13f   :  { %v69_v19 = vsel %vm46_vm1, %v62_v16, %v67_v18 }
 0x140   :  { %v70_v20 = vsub.f32 %v58_v17, %v69_v19 }
 0x142   :  { %v71_v21 = vmul.f32 1.442695, %v70_v20 }
 0x144   :  { %125 = vpow2.f32 %v71_v21 }
 0x145   :  { %127 = vpow2.f32 %v77_v25 }
 0x146   :  { %129 = vpow2.f32 %v88_v26 }
 0x14e   :  { %v126_v22 = vpop.eup %125 }
 0x14f   :  { %v74_v23 = vsel %vm46_vm1, %v126_v22, 0.0  ;;  %v73_v24 = vsel %vm46_vm1, 0.0, %v126_v22  ;;  %v128_v27 = vpop.eup %127 }
 0x150   :  { %91 = vadd.xlane.f32.xlu1 %v74_v23  ;;  %80 = vadd.xlane.f32.xlu0 %v73_v24  ;;  %v130_v28 = vpop.eup %129  ;;  %v79_v32 = vmul.f32 %v128_v27, %v75_v30 }
 0x151   :  { %v90_v31 = vmul.f32 %v130_v28, %v85_v29 }
 0x1dd   :  { %v92_v33 = vpop.xlane.xlu1 %91  ;;  %v81_v34 = vpop.xlane.xlu0 %80 }
 0x1de   :  { %v93_v35 = vadd.f32 %v92_v33, %v90_v31  ;;  %v82_v36 = vadd.f32 %v81_v34, %v79_v32 }
 0x1e0   :  { %94 = vst.msk [vmem:[#allocation5] sm:$0xff] %vm39_vm0, %v93_v35  ;;  %84 = vst.msk [vmem:[#allocation3] sm:$0xff] %vm39_vm0, %v82_v36 }
 0x1e7   :  { %v101_v37 = vld [vmem:[#allocation3] sm:$0xff]  ;;  %v107_v38 = vld [vmem:[#allocation5] sm:$0xff] }
 0x1e8   :  { %131 = vlog2.f32 %v101_v37 }
 0x1e9   :  { %133 = vlog2.f32 %v107_v38 }
 0x1f2   :  { %v132_v39 = vpop.eup %131 }
 0x1f3   :  { %v103_v40 = vmul.f32 0.6931472, %v132_v39  ;;  %v134_v41 = vpop.eup %133 }
 0x1f4   :  { %v109_v45 = vmul.f32 0.6931472, %v134_v41 }
 0x1f5   :  { %v104_v43 = vadd.f32 %v103_v40, %v100_v42 }
 0x1f7   :  { %v106_v46 = vadd.f32 %v105_v44, %v104_v43 }
 0x1f9   :  { %v110_v47 = vadd.f32 %v109_v45, %v106_v46 }
 0x1fb   :  { %111 = vst.msk [vmem:[%s247_s2] sm:$0xff] %vm39_vm0, %v110_v47 }
 0x1fc   :  { %116 = vsyncpa [#allocation7], 1 }
 0x1fd   :  { %117 = vsyncpa [#allocation9], 1 }

</bundles_post_ra>
